<compile_context>
chip_gen: v7x
topology: tpu7x:2x2x1
jax: 0.10.0
libtpu: 0.0.40
codegen_flags: <defaults>
</compile_context>

<pallas_src>
import functools

import jax
import jax.numpy as jnp
from jax import lax
from jax.experimental import pallas as pl
from jax.experimental.pallas import tpu as pltpu


# ----------------------------- helpers ------------------------------------


def _round_up(x: int, m: int) -> int:
    return ((x + m - 1) // m) * m


def _pad_axis(a, axis: int, target: int):
    cur = a.shape[axis]
    if cur == target:
        return a
    widths = [(0, 0)] * a.ndim
    widths[axis] = (0, target - cur)
    return jnp.pad(a, widths)


# --------------------- tiled linear:  x @ W^T + b --------------------------


def _linear_kernel(x_ref, w_ref, b_ref, o_ref, acc_ref):
    # x_ref: (tm, tk), w_ref: (tn, tk) [torch (out,in) layout], b_ref: (1, tn)
    k = pl.program_id(2)

    @pl.when(k == 0)
    def _():
        acc_ref[...] = jnp.zeros_like(acc_ref)

    acc_ref[...] += lax.dot_general(
        x_ref[...], w_ref[...],
        dimension_numbers=(((1,), (1,)), ((), ())),   # contract K with K
        preferred_element_type=jnp.float32,
    )

    @pl.when(k == pl.num_programs(2) - 1)
    def _():
        o_ref[...] = (acc_ref[...] + b_ref[...].astype(jnp.float32)).astype(o_ref.dtype)


def linear_pallas(x2d, w, b, *, compute_dtype=None, out_dtype=None,
                  tm=256, tn=256, tk=512):
    """x2d: (M, K); w: (N_out, K) torch layout; b: (N_out,). Returns (M, N_out)."""
    M, K = x2d.shape
    n_out = w.shape[0]
    out_dtype = out_dtype if out_dtype is not None else x2d.dtype
    in_bytes = jnp.dtype(x2d.dtype).itemsize

    # Effective tiles: clamp to (8,128)-aligned full dims for small problems.
    tm_e = min(tm, _round_up(M, 8))
    tn_e = min(tn, _round_up(n_out, 128))
    tk_e = min(tk, _round_up(K, 128))

    mp = _round_up(M, tm_e)
    np_ = _round_up(n_out, tn_e)
    kp = _round_up(K, tk_e)

    xp = _pad_axis(_pad_axis(x2d, 0, mp), 1, kp)
    wp = _pad_axis(_pad_axis(w, 0, np_), 1, kp)
    bp = _pad_axis(b.reshape(1, -1), 1, np_).astype(jnp.float32)
    if compute_dtype is not None:
        xp = xp.astype(compute_dtype)
        wp = wp.astype(compute_dtype)

    grid = (mp // tm_e, np_ // tn_e, kp // tk_e)

    cost = pl.CostEstimate(
        flops=2 * M * K * n_out,
        transcendentals=0,
        bytes_accessed=(M * K + K * n_out + M * n_out) * in_bytes,
    )

    out_padded = pl.pallas_call(
        _linear_kernel,
        out_shape=jax.ShapeDtypeStruct((mp, np_), out_dtype),
        grid_spec=pltpu.PrefetchScalarGridSpec(
            num_scalar_prefetch=0,
            grid=grid,
            in_specs=[
                pl.BlockSpec((tm_e, tk_e), lambda i, j, k: (i, k)),
                pl.BlockSpec((tn_e, tk_e), lambda i, j, k: (j, k)),
                pl.BlockSpec((1, tn_e), lambda i, j, k: (0, j)),
            ],
            out_specs=pl.BlockSpec((tm_e, tn_e), lambda i, j, k: (i, j)),
            scratch_shapes=[pltpu.VMEM((tm_e, tn_e), jnp.float32)],
        ),
        compiler_params=pltpu.CompilerParams(
            dimension_semantics=("parallel", "parallel", "arbitrary")),
        cost_estimate=cost,
    )(xp, wp, bp)

    return out_padded[:M, :n_out]


# -------------------- flash-style multi-head attention ---------------------


def _mha_kernel(q_ref, k_ref, v_ref, o_ref, m_sc, l_sc, acc_sc, *, scale, seq_len):
    neg = jnp.float32(-1e30)
    ki = pl.program_id(2)

    @pl.when(ki == 0)
    def _():
        m_sc[...] = jnp.full_like(m_sc, neg)
        l_sc[...] = jnp.zeros_like(l_sc)
        acc_sc[...] = jnp.zeros_like(acc_sc)

    q = q_ref[0]   # (tq, D)
    k = k_ref[0]   # (tkv, D)
    v = v_ref[0]   # (tkv, D)
    tq, tkv = q.shape[0], k.shape[0]

    s = lax.dot_general(q, k, (((1,), (1,)), ((), ())),
                        preferred_element_type=jnp.float32) * scale   # (tq, tkv)

    # Mask padded key positions (sequence may be zero-padded to the tile size).
    kv_pos = ki * tkv + lax.broadcasted_iota(jnp.int32, (tq, tkv), 1)
    s = jnp.where(kv_pos < seq_len, s, neg)

    m_prev = m_sc[...]
    m_new = jnp.maximum(m_prev, s.max(axis=-1, keepdims=True))
    alpha = jnp.exp(m_prev - m_new)
    p = jnp.exp(s - m_new)
    l_sc[...] = alpha * l_sc[...] + p.sum(axis=-1, keepdims=True)
    acc_sc[...] = alpha * acc_sc[...] + lax.dot_general(
        p.astype(v.dtype), v, (((1,), (0,)), ((), ())),
        preferred_element_type=jnp.float32)
    m_sc[...] = m_new

    @pl.when(ki == pl.num_programs(2) - 1)
    def _():
        o_ref[0] = (acc_sc[...] / l_sc[...]).astype(o_ref.dtype)


def mha_pallas(q, k, v, scale, *, out_dtype):
    """q, k, v: (B*H, N, D). Returns (B*H, N, D) softmax(q k^T * scale) v."""
    bh, n, d = q.shape
    np_ = _round_up(n, 8) if n <= 128 else _round_up(n, 128)
    t_seq = min(128, np_)

    qp = _pad_axis(q, 1, np_)
    kp = _pad_axis(k, 1, np_)
    vp = _pad_axis(v, 1, np_)

    grid = (bh, np_ // t_seq, np_ // t_seq)
    kernel = functools.partial(_mha_kernel, scale=scale, seq_len=n)
    in_bytes = jnp.dtype(q.dtype).itemsize

    cost = pl.CostEstimate(
        flops=4 * bh * n * n * d,
        transcendentals=bh * n * n,
        bytes_accessed=4 * bh * n * d * in_bytes,
    )

    out = pl.pallas_call(
        kernel,
        out_shape=jax.ShapeDtypeStruct((bh, np_, d), out_dtype),
        grid_spec=pltpu.PrefetchScalarGridSpec(
            num_scalar_prefetch=0,
            grid=grid,
            in_specs=[
                pl.BlockSpec((1, t_seq, d), lambda b, qi, ki: (b, qi, 0)),
                pl.BlockSpec((1, t_seq, d), lambda b, qi, ki: (b, ki, 0)),
                pl.BlockSpec((1, t_seq, d), lambda b, qi, ki: (b, ki, 0)),
            ],
            out_specs=pl.BlockSpec((1, t_seq, d), lambda b, qi, ki: (b, qi, 0)),
            scratch_shapes=[
                pltpu.VMEM((t_seq, 1), jnp.float32),   # running max m
                pltpu.VMEM((t_seq, 1), jnp.float32),   # running sum l
                pltpu.VMEM((t_seq, d), jnp.float32),   # accumulator
            ],
        ),
        compiler_params=pltpu.CompilerParams(
            dimension_semantics=("parallel", "parallel", "arbitrary")),
        cost_estimate=cost,
    )(qp, kp, vp)

    return out[:, :n, :]


# ----------------------------- full module ---------------------------------


def custom_attention(x, qkv_w, qkv_b, proj_w, proj_b, num_heads, *, compute_dtype=None):
    """x: (B, N, C); qkv_w: (3C, C); qkv_b: (3C,); proj_w: (C, C); proj_b: (C,)."""
    B, N, C = x.shape
    H = num_heads
    D = C // H
    scale = float(D) ** -0.5

    x2d = x.reshape(B * N, C)
    qkv = linear_pallas(x2d, qkv_w, qkv_b,
                        compute_dtype=compute_dtype, out_dtype=x.dtype)  # (B*N, 3C)

    # Head split (layout plumbing kept in plain JAX, matches torch permute order).
    qkv = qkv.reshape(B, N, 3, H, D).transpose(2, 0, 3, 1, 4)            # (3, B, H, N, D)
    q = qkv[0].reshape(B * H, N, D)
    k = qkv[1].reshape(B * H, N, D)
    v = qkv[2].reshape(B * H, N, D)
    if compute_dtype is not None:
        q = q.astype(compute_dtype)
        k = k.astype(compute_dtype)
        v = v.astype(compute_dtype)

    # q_norm / k_norm are Identity; attn_drop / proj_drop have p=0.0 -> no-ops.
    o = mha_pallas(q, k, v, scale, out_dtype=x.dtype)                    # (B*H, N, D)
    o = o.reshape(B, H, N, D).transpose(0, 2, 1, 3).reshape(B * N, C)

    out = linear_pallas(o, proj_w, proj_b,
                        compute_dtype=compute_dtype, out_dtype=x.dtype)
    return out.reshape(B, N, C)


# ----------------------------- reference ------------------------------------


def reference_attention(x, qkv_w, qkv_b, proj_w, proj_b, num_heads):
    B, N, C = x.shape
    H = num_heads
    D = C // H
    scale = float(D) ** -0.5
    hp = lax.Precision.HIGHEST
    qkv = jnp.einsum("bnc,oc->bno", x, qkv_w, precision=hp) + qkv_b
    qkv = qkv.reshape(B, N, 3, H, D).transpose(2, 0, 3, 1, 4)
    q, k, v = qkv[0], qkv[1], qkv[2]
    attn = jnp.einsum("bhqd,bhkd->bhqk", q, k, precision=hp) * scale
    attn = jax.nn.softmax(attn, axis=-1)
    out = jnp.einsum("bhqk,bhkd->bhqd", attn, v, precision=hp)
    out = out.transpose(0, 2, 1, 3).reshape(B, N, C)
    return jnp.einsum("bnc,oc->bno", out, proj_w, precision=hp) + proj_b


if __name__ == "__main__":
    # Small shapes consistent with the module: B=2, seq N=8, embed_dim C=32, heads=4.
    B, N, C, H = 2, 8, 32, 4

    key = jax.random.PRNGKey(0)
    kx, kw1, kb1, kw2, kb2 = jax.random.split(key, 5)
    x = jax.random.normal(kx, (B, N, C), dtype=jnp.float32)
    qkv_w = jax.random.normal(kw1, (3 * C, C), dtype=jnp.float32) * 0.05
    qkv_b = jax.random.normal(kb1, (3 * C,), dtype=jnp.float32) * 0.05
    proj_w = jax.random.normal(kw2, (C, C), dtype=jnp.float32) * 0.05
    proj_b = jax.random.normal(kb2, (C,), dtype=jnp.float32) * 0.05

    ref = reference_attention(x, qkv_w, qkv_b, proj_w, proj_b, H)

    # f32 compute path.
    out = custom_attention(x, qkv_w, qkv_b, proj_w, proj_b, H, compute_dtype=None)
    out = jax.block_until_ready(out)
    assert out.shape == (B, N, C), out.shape
    assert jnp.allclose(out, ref, atol=1e-3, rtol=1e-3), "f32 mismatch vs reference"

    # bf16 inputs / f32 accumulation path (the recommended fast path).
    out_bf16 = custom_attention(x, qkv_w, qkv_b, proj_w, proj_b, H,
                                compute_dtype=jnp.bfloat16)
    out_bf16 = jax.block_until_ready(out_bf16)
    assert jnp.allclose(out_bf16, ref, atol=5e-2, rtol=5e-2), "bf16 mismatch vs reference"

    print("KERNEL_OK")
</pallas_src>

<mosaic_0001>
module attributes {stable_mosaic.version = 11 : i64} {
  func.func @_linear_kernel(%arg0: i32, %arg1: i32, %arg2: i32, %arg3: memref<16x128xf32, #tpu.memory_space<vmem>>, %arg4: memref<128x128xf32, #tpu.memory_space<vmem>>, %arg5: memref<1x128xf32, #tpu.memory_space<vmem>>, %arg6: memref<16x128xf32, #tpu.memory_space<vmem>>, %arg7: memref<16x128xf32, #tpu.memory_space<vmem>>) attributes {dimension_semantics = [#tpu.dimension_semantics<parallel>, #tpu.dimension_semantics<parallel>, #tpu.dimension_semantics<arbitrary>], iteration_bounds = array<i64: 1, 1, 1>, scalar_prefetch = 0 : i64, scratch_operands = 1 : i64, tpu.core_type = #tpu.core_type<tc>, window_params = [{transform_indices = @transform_0, window_bounds = array<i64: 16, 128>}, {transform_indices = @transform_1, window_bounds = array<i64: 128, 128>}, {transform_indices = @transform_2, window_bounds = array<i64: 1, 128>}, {transform_indices = @transform_3, window_bounds = array<i64: 16, 128>}]} {
    %c0_i32 = arith.constant 0 : i32
    %0 = arith.cmpi eq, %arg2, %c0_i32 : i32
    %1 = arith.extui %0 : i1 to i32
    %c0_i32_0 = arith.constant 0 : i32
    %2 = arith.cmpi ne, %1, %c0_i32_0 : i32
    scf.if %2 {
      %cst_10 = arith.constant 0.000000e+00 : f32
      %12 = vector.broadcast %cst_10 : f32 to vector<16x128xf32>
      %c0_11 = arith.constant 0 : index
      %c0_12 = arith.constant 0 : index
      %13 = vector.load %arg7[%c0_11, %c0_12] : memref<16x128xf32, #tpu.memory_space<vmem>>, vector<16x128xf32>
      tpu.vector_store %arg7[%c0_11, %c0_12], %12 {strides = array<i32>} : memref<16x128xf32, #tpu.memory_space<vmem>>, vector<16x128xf32>,
    } else {
    }
    %c0 = arith.constant 0 : index
    %c0_1 = arith.constant 0 : index
    %3 = vector.load %arg7[%c0, %c0_1] : memref<16x128xf32, #tpu.memory_space<vmem>>, vector<16x128xf32>
    %c0_2 = arith.constant 0 : index
    %c0_3 = arith.constant 0 : index
    %4 = vector.load %arg3[%c0_2, %c0_3] : memref<16x128xf32, #tpu.memory_space<vmem>>, vector<16x128xf32>
    %c0_4 = arith.constant 0 : index
    %c0_5 = arith.constant 0 : index
    %5 = vector.load %arg4[%c0_4, %c0_5] : memref<128x128xf32, #tpu.memory_space<vmem>>, vector<128x128xf32>
    %cst = arith.constant dense<0.000000e+00> : vector<16x128xf32>
    %6 = tpu.matmul %4, %5, %cst {dimension_numbers = #tpu.dot_dimension_numbers<[1], [1], [0], [0], [0, 0, 1, 0], [], []>} : vector<16x128xf32>, vector<128x128xf32>, vector<16x128xf32> -> vector<16x128xf32>
    %7 = arith.addf %3, %6 : vector<16x128xf32>
    %c0_6 = arith.constant 0 : index
    %c0_7 = arith.constant 0 : index
    %8 = vector.load %arg7[%c0_6, %c0_7] : memref<16x128xf32, #tpu.memory_space<vmem>>, vector<16x128xf32>
    tpu.vector_store %arg7[%c0_6, %c0_7], %7 {strides = array<i32>} : memref<16x128xf32, #tpu.memory_space<vmem>>, vector<16x128xf32>,
    %c0_i32_8 = arith.constant 0 : i32
    %9 = arith.cmpi eq, %arg2, %c0_i32_8 : i32
    %10 = arith.extui %9 : i1 to i32
    %c0_i32_9 = arith.constant 0 : i32
    %11 = arith.cmpi ne, %10, %c0_i32_9 : i32
    scf.if %11 {
      %c0_10 = arith.constant 0 : index
      %c0_11 = arith.constant 0 : index
      %12 = vector.load %arg7[%c0_10, %c0_11] : memref<16x128xf32, #tpu.memory_space<vmem>>, vector<16x128xf32>
      %c0_12 = arith.constant 0 : index
      %c0_13 = arith.constant 0 : index
      %13 = vector.load %arg5[%c0_12, %c0_13] : memref<1x128xf32, #tpu.memory_space<vmem>>, vector<1x128xf32>
      %14 = vector.broadcast %13 : vector<1x128xf32> to vector<16x128xf32>
      %15 = arith.addf %12, %14 : vector<16x128xf32>
      %c0_14 = arith.constant 0 : index
      %c0_15 = arith.constant 0 : index
      %16 = vector.load %arg6[%c0_14, %c0_15] : memref<16x128xf32, #tpu.memory_space<vmem>>, vector<16x128xf32>
      tpu.vector_store %arg6[%c0_14, %c0_15], %15 {strides = array<i32>} : memref<16x128xf32, #tpu.memory_space<vmem>>, vector<16x128xf32>,
    } else {
    }
    return
  }
  func.func @transform_0(%arg0: i32, %arg1: i32, %arg2: i32) -> (i32, i32) {
    %c0_i32 = arith.constant 0 : i32
    return %arg0, %arg2 : i32, i32
  }
  func.func @transform_1(%arg0: i32, %arg1: i32, %arg2: i32) -> (i32, i32) {
    %c0_i32 = arith.constant 0 : i32
    return %arg1, %arg2 : i32, i32
  }
  func.func @transform_2(%arg0: i32, %arg1: i32, %arg2: i32) -> (i32, i32) {
    %c0_i32 = arith.constant 0 : i32
    %c0_i32_0 = arith.constant 0 : i32
    return %c0_i32, %arg1 : i32, i32
  }
  func.func @transform_3(%arg0: i32, %arg1: i32, %arg2: i32) -> (i32, i32) {
    %c0_i32 = arith.constant 0 : i32
    return %arg0, %arg1 : i32, i32
  }
}

</mosaic_0001>

<bundles_post_ra>
// kernel: tpu_custom_call.1
= control target key start
LH: loop header
LB: loop body
LE: loop exit
PB: predicated region body
PF: predicated region fallthrough
CT: control target
= control target key end

     0   :  { %8 = vsyncpa [#allocation4], 0  ;;  %s418_s0 = inlined_call_operand.hbm [shape: f32[16,128], index: 0, kind: input, shape index: {}]   ;;  %s419_s1 = inlined_call_operand.hbm [shape: f32[128,128], index: 1, kind: input, shape index: {}]   ;;  %s420_s2 = inlined_call_operand.vmem [shape: f32[1,128], index: 2, kind: input, shape index: {}]   ;;  %s421_s3 = inlined_call_operand.hbm [shape: f32[16,128], index: 3, kind: output, shape index: {}]  }
   0x1   :  { %9 = vsyncpa [#allocation7], 0 }
   0x2   :  { %10 = vsyncpa [#allocation5], 0  ;;  %s345_s12 = smov [#allocation3]   ;;  %s273_s16 = scalar_lea.hbm %s418_s0, 256 }
   0x3   :  { %s16_s13 = sshll.u32 %s345_s12, 4  ;;  %p274_p0 = scmp.ne.s32.totalorder %s418_s0, %s273_s16  ;;  %s17_s13 = int_to_ptr.vmem [resolvable:$true] %s16_s13 }
   0x4   :  { %p277_p1 = scmp.lt.u32.totalorder %s273_s16, %s418_s0 }
   0x6   :  { %p279_p2 = pnand %p277_p1, %p274_p0 }
   0x8   :  { %282 = shalt.err (!%p279_p2)
}
   0x9   :  { %s283_s21 = scalar_lea.vmem %s17_s13, 256  ;;  %p288_p4 = scmp.lt.s32.totalorder %s17_s13, %s17_s13 }
   0xa   :  { %p284_p3 = scmp.ne.s32.totalorder %s17_s13, %s283_s21  ;;  %p289_p5 = scmp.lt.s32.totalorder %s283_s21, %s283_s21 }
   0xc   :  { %p290_p6 = por %p289_p5, %p288_p4 }
   0xe   :  { %p291_p7 = pnand %p290_p6, %p284_p3 }
  0x10   :  { %294 = shalt.err (!%p291_p7)
}
  0x11   :  { %s346_s22 = smov 128   ;;  %s347_s23 = smov 8  }
  0x12   :  { %22 = dma.hbm_to_vmem [thread:$0]  %s418_s0, 256, %s17_s13, [#allocation4], %s346_s22, %s346_s22, %s347_s23  }
  0x13   :  { %s348_s26 = smov [#allocation6]   ;;  %s295_s30 = scalar_lea.hbm %s419_s1, 2048 }
  0x14   :  { %s28_s27 = sshll.u32 %s348_s26, 4  ;;  %p296_p8 = scmp.ne.s32.totalorder %s419_s1, %s295_s30  ;;  %s29_s27 = int_to_ptr.vmem [resolvable:$true] %s28_s27 }
  0x15   :  { %p299_p9 = scmp.lt.u32.totalorder %s295_s30, %s419_s1 }
  0x17   :  { %p301_p10 = pnand %p299_p9, %p296_p8 }
  0x19   :  { %304 = shalt.err (!%p301_p10)
}
  0x1a   :  { %s305_s8 = scalar_lea.vmem %s29_s27, 2048  ;;  %p310_p12 = scmp.lt.s32.totalorder %s29_s27, %s29_s27 }
  0x1b   :  { %p306_p11 = scmp.ne.s32.totalorder %s29_s27, %s305_s8  ;;  %p311_p13 = scmp.lt.s32.totalorder %s305_s8, %s305_s8 }
  0x1d   :  { %p312_p0 = por %p311_p13, %p310_p12 }
  0x1f   :  { %p313_p1 = pnand %p312_p0, %p306_p11 }
  0x21   :  { %316 = shalt.err (!%p313_p1)
}
  0x22   :  { %34 = dma.hbm_to_vmem [thread:$0]  %s419_s1, 2048, %s29_s27, [#allocation7], %s346_s22, %s346_s22, %s347_s23  }
  0x23   :  { %339 = dma.done.wait [#allocation4], 256  }
  0x24   :  { %340 = vsyncadd [#allocation4], 4294967040 }
  0x25   :  { %341 = dma.done.wait [#allocation7], 2048  }
  0x26   :  { %342 = vsyncadd [#allocation7], 4294965248  ;;  %v53_v0 = vld [vmem:[#allocation6] sm:$0xff]  ;;  %v54_v1 = vld [vmem:[#allocation6 + $0x8] sm:$0xff]  ;;  %s349_s11 = smov [#allocation8]  }
  0x27   :  { %v55_v2 = vld [vmem:[#allocation6 + $0x10] sm:$0xff]  ;;  %v236_v3 = vpack.c.bf16 %v54_v1, %v53_v0  ;;  %v56_v4 = vld [vmem:[#allocation6 + $0x18] sm:$0xff]  ;;  %v57_v7 = vld [vmem:[#allocation6 + $0x20] sm:$0xff]  ;;  %s169_s12 = sshll.u32 %s349_s11, 4  ;;  %s170_s12 = int_to_ptr.vmem [resolvable:$true] %s169_s12 }
  0x28   :  { %v240_v5 = vpack.c.bf16 %v56_v4, %v55_v2  ;;  %v51_v6 = vld [vmem:[#allocation3] sm:$0xff]  ;;  %v58_v8 = vld [vmem:[#allocation6 + $0x28] sm:$0xff]  ;;  %v60_v11 = vld [vmem:[#allocation6 + $0x38] sm:$0xff]  ;;  %s317_s13 = scalar_lea.vmem %s170_s12, 256  ;;  %p322_p3 = scmp.lt.s32.totalorder %s170_s12, %s170_s12 }
  0x29   :  { %237 = vmatprep.subr.bf16.mxu0 %v236_v3  ;;  %233 = vmatprep.mubr.f32.mxu0 %v51_v6  ;;  %v244_v9 = vpack.c.bf16 %v58_v8, %v57_v7  ;;  %v59_v10 = vld [vmem:[#allocation6 + $0x30] sm:$0xff]  ;;  %v61_v13 = vld [vmem:[#allocation6 + $0x40] sm:$0xff]  ;;  %v62_v14 = vld [vmem:[#allocation6 + $0x48] sm:$0xff]  ;;  %p318_p2 = scmp.ne.s32.totalorder %s170_s12, %s317_s13  ;;  %p323_p4 = scmp.lt.s32.totalorder %s317_s13, %s317_s13 }
  0x2a   :  { %239 = vmatpush3.bf16.xpose.msra.mxu0 %v236_v3  ;;  %v248_v12 = vpack.c.bf16 %v60_v11, %v59_v10  ;;  %v252_v15 = vpack.c.bf16 %v62_v14, %v61_v13  ;;  %v63_v16 = vld [vmem:[#allocation6 + $0x50] sm:$0xff]  ;;  %v64_v17 = vld [vmem:[#allocation6 + $0x58] sm:$0xff]  ;;  %v65_v19 = vld [vmem:[#allocation6 + $0x60] sm:$0xff] }
  0x2b   :  { %241 = vmatprep.subr.bf16.mxu0 %v240_v5  ;;  %v256_v18 = vpack.c.bf16 %v64_v17, %v63_v16  ;;  %v66_v20 = vld [vmem:[#allocation6 + $0x68] sm:$0xff]  ;;  %v67_v22 = vld [vmem:[#allocation6 + $0x70] sm:$0xff]  ;;  %v68_v23 = vld [vmem:[#allocation6 + $0x78] sm:$0xff]  ;;  %p324_p5 = por %p323_p4, %p322_p3 }
  0x2c   :  { %v260_v21 = vpack.c.bf16 %v66_v20, %v65_v19  ;;  %v264_v24 = vpack.c.bf16 %v68_v23, %v67_v22  ;;  %v52_v25 = vld [vmem:[#allocation3 + $0x8] sm:$0xff]  ;;  %v182_v26 = vld [vmem:[%s420_s2] ss:$0 sm:$0xff] }
  0x2d   :  { %p325_p6 = pnand %p324_p5, %p318_p2 }
  0x32   :  { %243 = vmatpush3.bf16.xpose.msra.mxu0 %v240_v5 }
  0x33   :  { %245 = vmatprep.subr.bf16.mxu0 %v244_v9 }
  0x3a   :  { %247 = vmatpush3.bf16.xpose.msra.mxu0 %v244_v9 }
  0x3b   :  { %249 = vmatprep.subr.bf16.mxu0 %v248_v12 }
  0x42   :  { %251 = vmatpush3.bf16.xpose.msra.mxu0 %v248_v12 }
  0x43   :  { %253 = vmatprep.subr.bf16.mxu0 %v252_v15 }
  0x4a   :  { %255 = vmatpush3.bf16.xpose.msra.mxu0 %v252_v15 }
  0x4b   :  { %257 = vmatprep.subr.bf16.mxu0 %v256_v18 }
  0x52   :  { %259 = vmatpush3.bf16.xpose.msra.mxu0 %v256_v18 }
  0x53   :  { %261 = vmatprep.subr.bf16.mxu0 %v260_v21 }
  0x5a   :  { %263 = vmatpush3.bf16.xpose.msra.mxu0 %v260_v21 }
  0x5b   :  { %265 = vmatprep.subr.bf16.mxu0 %v264_v24 }
  0x62   :  { %267 = vmatpush3.bf16.xpose.msra.mxu0 %v264_v24 }
  0x69   :  { %234 = vmatmul.mubr.f32.vlgmr.msra.gmra.mrb[0].mxu0 %v52_v25 }
 0x13c   :  { %v235_v27 = vpop.f32.mrb[0].mxu0 }
 0x13d   :  { %v161_v28 = vadd.f32 %v235_v27, %v182_v26  ;;  %v135_v29 = vpop.f32.mrb[1].mxu0 }
 0x13e   :  { %v160_v30 = vadd.f32 %v182_v26, %v135_v29 }
 0x13f   :  { %163 = vst [vmem:[#allocation8 + $0x8] sm:$0xff] %v161_v28 }
 0x140   :  { %162 = vst [vmem:[#allocation8] sm:$0xff] %v160_v30 }
 0x141   :  { %328 = shalt.err (!%p325_p6)
}
 0x142   :  { %s329_s2 = scalar_lea.hbm %s421_s3, 256 }
 0x143   :  { %p330_p7 = scmp.ne.s32.totalorder %s421_s3, %s329_s2  ;;  %p333_p8 = scmp.lt.u32.totalorder %s329_s2, %s421_s3 }
 0x145   :  { %p335_p9 = pnand %p333_p8, %p330_p7 }
 0x147   :  { %338 = shalt.err (!%p335_p9)
}
 0x148   :  { %175 = dma.vmem_to_hbm [thread:$0]  %s170_s12, 256, %s421_s3, [#allocation5], %s346_s22, %s346_s22, %s347_s23  }
 0x149   :  { %343 = dma.done.wait [#allocation5], 256  }
 0x14a   :  { %344 = vsyncadd [#allocation5], 4294967040 }
 0x14b   :  { %179 = vsyncpa [#allocation4], 1 }
 0x14c   :  { %180 = vsyncpa [#allocation7], 1 }
 0x14d   :  { %181 = vsyncpa [#allocation5], 1 }

</bundles_post_ra>
